<compile_context>
chip_gen: v7x
topology: tpu7x:2x2x1
jax: 0.10.0
libtpu: 0.0.40
codegen_flags: <defaults>
</compile_context>

<pallas_src>
import functools
import math

import jax
import jax.numpy as jnp
from jax.experimental import pallas as pl
from jax.experimental.pallas import tpu as pltpu


# --------------------------- small helpers -----------------------------------


def _round_up(x, m):
    return (x + m - 1) // m * m


def _cdiv(a, b):
    return (a + b - 1) // b


def _pick_tile(n, max_tile, mult):
    """Largest tile <= ~max_tile (a multiple of `mult`) minimizing padding of n."""
    n_pad = _round_up(max(n, 1), mult)
    max_tile = max(mult, _round_up(max_tile, mult))
    if n_pad <= max_tile:
        return n_pad
    n_blocks = _cdiv(n_pad, max_tile)
    return _round_up(_cdiv(n_pad, n_blocks), mult)


def _vmem_cap_bytes():
    """~75% of physical VMEM (v5e/v6e: 128 MiB -> ~96 MiB, v7x: 64 MiB -> ~48 MiB)."""
    try:
        cap = int(getattr(pltpu.get_tpu_info(), "vmem_capacity_bytes", 64 << 20))
    except Exception:
        cap = 64 << 20
    return max(32 << 20, (cap * 3) // 4)


def _pad_cast(a, rows, cols, dtype):
    """Cast and zero-pad; pass-through when already the right shape/dtype."""
    a = a.astype(dtype)
    r, c = a.shape
    if (r, c) == (rows, cols):
        return a
    return jnp.pad(a, ((0, rows - r), (0, cols - c)))


def _stage2_bytes(tm, tk, fp, itm, x_bytes):
    return (2 * 2 * tm * tk * itm     # two adjacency streams, double-buffered
            + x_bytes                 # gated slab (streamed or VMEM-resident)
            + 2 * tm * 2 * fp * 4)    # f32 output block, double-buffered


# --------------------------- stage 1: feature transform ----------------------


def _feature_kernel(f_ref, w_ref, x_ref, *, gamma, fp):
    """x = [elu(f@Wm)*Att | relu(f@Ws)*Att^2],  Att = exp(-gamma*relu(f@Ws)).

    w_ref holds [W_miu | W_sigma], each branch zero-padded to `fp` lanes.
    Zero padding is exact: padded columns give h=0 -> elu(0)=0, relu(0)=0,
    Att=1, so padded output lanes stay 0.
    """
    h = jnp.dot(f_ref[...], w_ref[...], preferred_element_type=jnp.float32)
    hm = h[:, :fp]
    hs = h[:, fp:]
    # ELU(alpha=1); clamp the unselected exp argument to avoid inf in dead branch.
    miu = jnp.where(hm > 0, hm, jnp.exp(jnp.minimum(hm, 0.0)) - 1.0)
    sig = jnp.maximum(hs, 0.0)                       # ReLU
    att = jnp.exp(-gamma * sig)                      # EUP
    # Two lane-aligned half stores (fp is a multiple of 128) — no concatenate temp.
    x_ref[:, :fp] = (miu * att).astype(x_ref.dtype)
    x_ref[:, fp:] = (sig * att * att).astype(x_ref.dtype)


# --------------------------- stage 2: tiled aggregation ----------------------


def _aggregate_kernel(adj1_ref, adj2_ref, x_ref, o_ref, *, fp, tk, x_resident):
    """o[:, :fp] += adj1 @ x_m ; o[:, fp:] += adj2 @ x_s over (rows, reduction)."""
    k = pl.program_id(1)

    @pl.when(k == 0)
    def _init():
        o_ref[...] = jnp.zeros_like(o_ref)

    if x_resident:
        # Gated slab is resident in VMEM (constant block index); slice by k here.
        start = pl.multiple_of(k * tk, tk)
        xm = x_ref[pl.ds(start, tk), pl.ds(0, fp)]
        xs = x_ref[pl.ds(start, tk), pl.ds(fp, fp)]
    else:
        # Lane-aligned ref slices (zero-cost views) fed straight to the dots.
        xm = x_ref[:, :fp]
        xs = x_ref[:, fp:]

    o_ref[:, :fp] += jnp.dot(adj1_ref[...], xm, preferred_element_type=jnp.float32)
    o_ref[:, fp:] += jnp.dot(adj2_ref[...], xs, preferred_element_type=jnp.float32)


# --------------------------- wrapper ------------------------------------------


def ggcl_f_forward(features, weight_miu, weight_sigma, adj_norm1, adj_norm2,
                   gamma=1.0, matmul_dtype=jnp.bfloat16,
                   row_tile=512, red_tile=2048):
    """JAX/Pallas equivalent of GGCL_F.forward (inference; dropout disabled).

    matmul_dtype: dtype of the adjacency matrices and gated feature slab fed to
      the HBM-bound aggregation matmuls (f32 accumulation always).  Defaults to
      bfloat16 (memory-bound stage); pass jnp.float32 for exact arithmetic.
    """
    # TODO(synk): training-mode dropout on `features` is not implemented
    # (F.dropout is identity when training=False; RNG-matched dropout omitted).
    # TODO(synk): optional fp8 adjacency fast path for v7x (scaled quantization)
    # not implemented.
    N, F_in = features.shape
    F_out = weight_miu.shape[1]
    out_dtype = features.dtype
    mm_dtype = jnp.dtype(jnp.float32 if matmul_dtype is None else matmul_dtype)
    itm = mm_dtype.itemsize
    sub = max(8, 32 // itm)                 # sublane multiple: f32=8, bf16=16, 8bit=32

    # Lane-pad each output branch to a multiple of 128 -> lane-dense stores.
    fp = _round_up(max(F_out, 1), 128)

    cap = _vmem_cap_bytes()
    budget = cap - (6 << 20)                # headroom for compiler scratch

    # ---- stage-2 tile selection ---------------------------------------------
    tm = _pick_tile(N, row_tile, sub)
    tk = _pick_tile(N, red_tile, 128)
    # Keep >=2 row tiles so the "parallel" row axis can occupy both v7x TCs.
    if _round_up(N, tm) // tm < 2 and N > 2 * sub:
        tm = _round_up(_cdiv(_round_up(N, sub), 2), sub)
    # Shrink until the double-buffered footprint fits the per-generation budget.
    while _stage2_bytes(tm, tk, fp, itm, 2 * tk * 2 * fp * itm) > budget:
        if tk > 512:
            tk = max(512, _round_up(tk // 2, 128))
        elif tm > max(sub, 128):
            tm = max(sub, _round_up(tm // 2, sub))
        else:
            break

    n_rows = _round_up(N, tm)               # padded output-row dimension
    n_red = _round_up(N, tk)                # padded reduction dimension

    # Keep the gated slab VMEM-resident when it fits (removes its re-streaming
    # once per row tile).  Counted x2 conservatively for pipeline buffering.
    x_stream_bytes = 2 * tk * 2 * fp * itm
    x_resident_bytes = 2 * n_red * 2 * fp * itm
    x_resident = _stage2_bytes(tm, tk, fp, itm, x_resident_bytes) <= budget

    # ---- pad / cast inputs (zero padding is exact; pass-through when no-op) --
    f32 = jnp.float32
    feats_p = _pad_cast(features, n_red, F_in, f32)
    w_cat = jnp.zeros((F_in, 2 * fp), f32)
    w_cat = w_cat.at[:, :F_out].set(weight_miu.astype(f32))
    w_cat = w_cat.at[:, fp:fp + F_out].set(weight_sigma.astype(f32))
    adj1_p = _pad_cast(adj_norm1, n_rows, n_red, mm_dtype)
    adj2_p = _pad_cast(adj_norm2, n_rows, n_red, mm_dtype)

    # ---- stage 1: fused feature transform + gating (own row tile & VMEM) -----
    # TODO(synk): F_in is taken whole per row tile; tile F_in with a reduction
    # axis if it ever becomes large enough to pressure VMEM.
    tr = tk
    while tr > 512 and (tr // 2) % 128 == 0:
        tr //= 2
    s1_bytes = (2 * tr * F_in * 4 + 2 * F_in * 2 * fp * 4 + 2 * tr * 2 * fp * itm)
    vmem1 = int(min(max(s1_bytes + (8 << 20), 16 << 20), cap))

    x = pl.pallas_call(
        functools.partial(_feature_kernel, gamma=float(gamma), fp=fp),
        out_shape=jax.ShapeDtypeStruct((n_red, 2 * fp), mm_dtype),
        grid=(n_red // tr,),
        in_specs=[
            pl.BlockSpec((tr, F_in), lambda i: (i, 0)),        # features
            pl.BlockSpec((F_in, 2 * fp), lambda i: (0, 0)),    # [Wm | Ws]
        ],
        out_specs=pl.BlockSpec((tr, 2 * fp), lambda i: (i, 0)),
        compiler_params=pltpu.CompilerParams(
            dimension_semantics=("parallel",),
            vmem_limit_bytes=vmem1),
    )(feats_p, w_cat)

    # ---- stage 2: tiled neighborhood aggregation -----------------------------
    if x_resident:
        x_spec = pl.BlockSpec((n_red, 2 * fp), lambda i, k: (0, 0))
        x_bytes = x_resident_bytes
    else:
        x_spec = pl.BlockSpec((tk, 2 * fp), lambda i, k: (k, 0))
        x_bytes = x_stream_bytes
    footprint2 = _stage2_bytes(tm, tk, fp, itm, x_bytes)
    vmem2 = int(min(max(footprint2 + (8 << 20), 16 << 20), cap))

    out = pl.pallas_call(
        functools.partial(_aggregate_kernel, fp=fp, tk=tk, x_resident=x_resident),
        out_shape=jax.ShapeDtypeStruct((n_rows, 2 * fp), jnp.float32),
        grid=(n_rows // tm, n_red // tk),
        in_specs=[
            pl.BlockSpec((tm, tk), lambda i, k: (i, k)),       # adj_norm1
            pl.BlockSpec((tm, tk), lambda i, k: (i, k)),       # adj_norm2
            x_spec,                                            # gated slab
        ],
        out_specs=pl.BlockSpec((tm, 2 * fp), lambda i, k: (i, 0)),
        compiler_params=pltpu.CompilerParams(
            dimension_semantics=("parallel", "arbitrary"),
            vmem_limit_bytes=vmem2),
    )(adj1_p, adj2_p, x)

    miu_out = out[:N, :F_out].astype(out_dtype)
    sigma_out = out[:N, fp:fp + F_out].astype(out_dtype)
    return miu_out, sigma_out


def xavier_uniform(key, shape, dtype=jnp.float32):
    fan_in, fan_out = shape
    bound = math.sqrt(6.0 / (fan_in + fan_out))
    return jax.random.uniform(key, shape, dtype, minval=-bound, maxval=bound)


def _reference(features, weight_miu, weight_sigma, adj1, adj2, gamma):
    miu = jax.nn.elu(features @ weight_miu)
    sigma = jax.nn.relu(features @ weight_sigma)
    att = jnp.exp(-gamma * sigma)
    return adj1 @ (miu * att), adj2 @ (sigma * att * att)


# --------------------------- main ---------------------------------------------


if __name__ == "__main__":
    key = jax.random.PRNGKey(0)
    k_f, k_a1, k_a2, k_wm, k_ws, k_f2, k_a3, k_a4 = jax.random.split(key, 8)

    # Small graph: 64 nodes, 32 -> 16 features.
    N, F_in, F_out = 64, 32, 16
    features = jax.random.normal(k_f, (N, F_in), jnp.float32)
    adj_norm1 = jax.random.uniform(k_a1, (N, N), jnp.float32) / N
    adj_norm2 = jax.random.uniform(k_a2, (N, N), jnp.float32) / N
    weight_miu = xavier_uniform(k_wm, (F_in, F_out))
    weight_sigma = xavier_uniform(k_ws, (F_in, F_out))
    gamma = 1.0

    miu_ref, sig_ref = _reference(features, weight_miu, weight_sigma,
                                  adj_norm1, adj_norm2, gamma)

    # Default (bf16 aggregation) fast path — looser tolerance.
    miu_bf, sig_bf = ggcl_f_forward(features, weight_miu, weight_sigma,
                                    adj_norm1, adj_norm2, gamma=gamma)
    jax.block_until_ready((miu_bf, sig_bf))
    assert jnp.allclose(miu_bf, miu_ref, atol=5e-2, rtol=5e-2)
    assert jnp.allclose(sig_bf, sig_ref, atol=5e-2, rtol=5e-2)

    # Exact f32 path — tight tolerance.
    miu_f32, sig_f32 = ggcl_f_forward(features, weight_miu, weight_sigma,
                                      adj_norm1, adj_norm2, gamma=gamma,
                                      matmul_dtype=jnp.float32)
    jax.block_until_ready((miu_f32, sig_f32))
    assert jnp.allclose(miu_f32, miu_ref, atol=1e-4, rtol=1e-4)
    assert jnp.allclose(sig_f32, sig_ref, atol=1e-4, rtol=1e-4)

    # Multi-tile exercise (2 row tiles x 2 reduction steps, resident gated slab).
    N2 = 192
    features2 = jax.random.normal(k_f2, (N2, F_in), jnp.float32)
    adj1_2 = jax.random.uniform(k_a3, (N2, N2), jnp.float32) / N2
    adj2_2 = jax.random.uniform(k_a4, (N2, N2), jnp.float32) / N2
    miu_ref2, sig_ref2 = _reference(features2, weight_miu, weight_sigma,
                                    adj1_2, adj2_2, gamma)
    miu_2, sig_2 = ggcl_f_forward(features2, weight_miu, weight_sigma,
                                  adj1_2, adj2_2, gamma=gamma,
                                  matmul_dtype=jnp.float32, red_tile=128)
    jax.block_until_ready((miu_2, sig_2))
    assert jnp.allclose(miu_2, miu_ref2, atol=1e-3, rtol=1e-3)
    assert jnp.allclose(sig_2, sig_ref2, atol=1e-3, rtol=1e-3)

    print("KERNEL_OK")
</pallas_src>

<mosaic_0001>
module attributes {stable_mosaic.version = 11 : i64} {
  func.func @_feature_kernel(%arg0: i32, %arg1: memref<128x32xf32, #tpu.memory_space<vmem>>, %arg2: memref<32x256xf32, #tpu.memory_space<vmem>>, %arg3: memref<128x256xbf16, #tpu.memory_space<vmem>>) attributes {dimension_semantics = [#tpu.dimension_semantics<parallel>], iteration_bounds = array<i64: 1>, scalar_prefetch = 0 : i64, scratch_operands = 0 : i64, tpu.core_type = #tpu.core_type<tc>, window_params = [{transform_indices = @transform_0, window_bounds = array<i64: 128, 32>}, {pipeline_mode = #tpu.pipeline_mode<synchronous>, transform_indices = @transform_1, window_bounds = array<i64: 32, 256>}, {transform_indices = @transform_2, window_bounds = array<i64: 128, 256>}]} {
    %c0 = arith.constant 0 : index
    %c0_0 = arith.constant 0 : index
    %0 = vector.load %arg1[%c0, %c0_0] : memref<128x32xf32, #tpu.memory_space<vmem>>, vector<128x32xf32>
    %c0_1 = arith.constant 0 : index
    %c0_2 = arith.constant 0 : index
    %1 = vector.load %arg2[%c0_1, %c0_2] : memref<32x256xf32, #tpu.memory_space<vmem>>, vector<32x256xf32>
    %cst = arith.constant dense<0.000000e+00> : vector<128x256xf32>
    %2 = tpu.matmul %0, %1, %cst {dimension_numbers = #tpu.dot_dimension_numbers<[1], [0], [0], [1], [0, 0, 1, 1], [], []>} : vector<128x32xf32>, vector<32x256xf32>, vector<128x256xf32> -> vector<128x256xf32>
    %3 = vector.extract_strided_slice %2 {offsets = [0, 0], sizes = [128, 128], strides = [1, 1]} : vector<128x256xf32> to vector<128x128xf32>
    %4 = vector.extract_strided_slice %2 {offsets = [0, 128], sizes = [128, 128], strides = [1, 1]} : vector<128x256xf32> to vector<128x128xf32>
    %cst_3 = arith.constant 0.000000e+00 : f32
    %5 = vector.broadcast %cst_3 : f32 to vector<128x128xf32>
    %6 = arith.cmpf ogt, %3, %5 : vector<128x128xf32>
    %cst_4 = arith.constant 0.000000e+00 : f32
    %7 = vector.broadcast %cst_4 : f32 to vector<128x128xf32>
    %8 = arith.minimumf %3, %7 : vector<128x128xf32>
    %9 = math.exp %8 : vector<128x128xf32>
    %cst_5 = arith.constant 1.000000e+00 : f32
    %10 = vector.broadcast %cst_5 : f32 to vector<128x128xf32>
    %11 = arith.subf %9, %10 : vector<128x128xf32>
    %12 = arith.select %6, %3, %11 : vector<128x128xi1>, vector<128x128xf32>
    %cst_6 = arith.constant 0.000000e+00 : f32
    %13 = vector.broadcast %cst_6 : f32 to vector<128x128xf32>
    %14 = arith.maximumf %4, %13 : vector<128x128xf32>
    %cst_7 = arith.constant -1.000000e+00 : f32
    %15 = vector.broadcast %cst_7 : f32 to vector<128x128xf32>
    %16 = arith.mulf %15, %14 : vector<128x128xf32>
    %17 = math.exp %16 : vector<128x128xf32>
    %18 = arith.mulf %12, %17 : vector<128x128xf32>
    %19 = arith.truncf %18 : vector<128x128xf32> to vector<128x128xbf16>
    %c0_8 = arith.constant 0 : index
    %c0_9 = arith.constant 0 : index
    %20 = vector.load %arg3[%c0_8, %c0_9] : memref<128x256xbf16, #tpu.memory_space<vmem>>, vector<128x128xbf16>
    tpu.vector_store %arg3[%c0_8, %c0_9], %19 {strides = array<i32>} : memref<128x256xbf16, #tpu.memory_space<vmem>>, vector<128x128xbf16>,
    %21 = arith.mulf %14, %17 : vector<128x128xf32>
    %22 = arith.mulf %21, %17 : vector<128x128xf32>
    %23 = arith.truncf %22 : vector<128x128xf32> to vector<128x128xbf16>
    %c0_10 = arith.constant 0 : index
    %c128 = arith.constant 128 : index
    %24 = vector.load %arg3[%c0_10, %c128] : memref<128x256xbf16, #tpu.memory_space<vmem>>, vector<128x128xbf16>
    tpu.vector_store %arg3[%c0_10, %c128], %23 {strides = array<i32>} : memref<128x256xbf16, #tpu.memory_space<vmem>>, vector<128x128xbf16>,
    return
  }
  func.func @transform_0(%arg0: i32) -> (i32, i32) {
    %c0_i32 = arith.constant 0 : i32
    %c0_i32_0 = arith.constant 0 : i32
    return %arg0, %c0_i32 : i32, i32
  }
  func.func @transform_1(%arg0: i32) -> (i32, i32) {
    %c0_i32 = arith.constant 0 : i32
    %c0_i32_0 = arith.constant 0 : i32
    %c0_i32_1 = arith.constant 0 : i32
    return %c0_i32, %c0_i32_0 : i32, i32
  }
  func.func @transform_2(%arg0: i32) -> (i32, i32) {
    %c0_i32 = arith.constant 0 : i32
    %c0_i32_0 = arith.constant 0 : i32
    return %arg0, %c0_i32 : i32, i32
  }
}

</mosaic_0001>

<bundles_post_ra>
// kernel: tpu_custom_call.1
= control target key start
LH: loop header
LB: loop body
LE: loop exit
PB: predicated region body
PF: predicated region fallthrough
CT: control target
= control target key end

     0   :  { %v830_v7 = vmov 0.0   ;;  %vm36_vm0 = vcmask 261120   ;;  %s1157_s0 = inlined_call_operand.vmem [shape: f32[128,32], index: 0, kind: input, shape index: {}]   ;;  %s1158_s1 = inlined_call_operand.vmem [shape: f32[32,256], index: 1, kind: input, shape index: {}]   ;;  %s1159_s2 = inlined_call_operand.hbm [shape: bf16[128,256], index: 2, kind: output, shape index: {}]  }
   0x1   :  { %v29_v0 = vld [vmem:[%s1158_s1 + $0x8] sm:$0xff]  ;;  %v31_v1 = vld [vmem:[%s1158_s1 + $0x18] sm:$0xff]  ;;  %v28_v2 = vld [vmem:[%s1158_s1] sm:$0xff]  ;;  %149 = vmatprep.mubr.f32.mxu0 %v830_v7  ;;  %197 = vmatprep.mubr.f32.mxu1 %v830_v7 }
   0x2   :  { %v726_v3 = vpack.c.bf16 %v31_v1, %v29_v0  ;;  %v30_v4 = vld [vmem:[%s1158_s1 + $0x10] sm:$0xff]  ;;  %v33_v5 = vld [vmem:[%s1158_s1 + $0x28] sm:$0xff]  ;;  %v35_v6 = vld [vmem:[%s1158_s1 + $0x38] sm:$0xff] }
   0x3   :  { %v728_v8 = vpack.c.bf16 %v30_v4, %v28_v2  ;;  %v730_v9 = vpack.c.bf16 %v35_v6, %v33_v5  ;;  %v32_v10 = vld [vmem:[%s1158_s1 + $0x20] sm:$0xff]  ;;  %v34_v11 = vld [vmem:[%s1158_s1 + $0x30] sm:$0xff] }
   0x4   :  { %727 = vmatprep.subr.bf16.mxu0 %v726_v3  ;;  %734 = vmatprep.subr.bf16.mxu1 %v726_v3  ;;  %v732_v12 = vpack.c.bf16 %v34_v11, %v32_v10  ;;  %v12_v13 = vld [vmem:[%s1157_s0] sm:$0xff] }
   0x5   :  { %729 = vmatpush1.bf16.msra.mxu0 %v728_v8  ;;  %736 = vmatpush1.bf16.msra.mxu1 %v728_v8  ;;  %v20_v14 = vld [vmem:[%s1157_s0 + $0x40] sm:$0xff] }
   0x6   :  { %731 = vmatprep.subr.bf16.mxu0 %v730_v9  ;;  %735 = vmatprep.subr.bf16.mxu1 %v730_v9 }
   0x9   :  { %733 = vmatpush1.bf16.msra.mxu0 %v732_v12  ;;  %737 = vmatpush1.bf16.msra.mxu1 %v732_v12 }
   0xa   :  { %7 = vsyncpa [#allocation3], 0  ;;  %v13_v15 = vld [vmem:[%s1157_s0 + $0x8] sm:$0xff]  ;;  %v14_v17 = vld [vmem:[%s1157_s0 + $0x10] sm:$0xff] }
   0xb   :  { %v21_v16 = vld [vmem:[%s1157_s0 + $0x48] sm:$0xff]  ;;  %v22_v18 = vld [vmem:[%s1157_s0 + $0x50] sm:$0xff]  ;;  %v15_v19 = vld [vmem:[%s1157_s0 + $0x18] sm:$0xff] }
   0xc   :  { %630 = vmatmul.mubr.msk.f32.vlgmr.msra.gmra.mrb[0].mxu0 %vm36_vm0, %v12_v13  ;;  %638 = vmatmul.mubr.msk.f32.vlgmr.msra.gmra.mrb[0].mxu1 %vm36_vm0, %v20_v14  ;;  %v23_v20 = vld [vmem:[%s1157_s0 + $0x58] sm:$0xff]  ;;  %v16_v21 = vld [vmem:[%s1157_s0 + $0x20] sm:$0xff]  ;;  %v17_v23 = vld [vmem:[%s1157_s0 + $0x28] sm:$0xff] }
   0xd   :  { %155 = vmatprep.mubr.f32.mxu0 %v830_v7  ;;  %203 = vmatprep.mubr.f32.mxu1 %v830_v7  ;;  %v24_v22 = vld [vmem:[%s1157_s0 + $0x60] sm:$0xff]  ;;  %v25_v24 = vld [vmem:[%s1157_s0 + $0x68] sm:$0xff]  ;;  %v18_v25 = vld [vmem:[%s1157_s0 + $0x30] sm:$0xff] }
   0xe   :  { %v26_v26 = vld [vmem:[%s1157_s0 + $0x70] sm:$0xff]  ;;  %v19_v27 = vld [vmem:[%s1157_s0 + $0x38] sm:$0xff] }
   0xf   :  { %v27_v28 = vld [vmem:[%s1157_s0 + $0x78] sm:$0xff]  ;;  %s831_s0 = smov [#allocation2]  }
  0x10   :  { %631 = vmatmul.mubr.msk.f32.gmra.mrb[2].mxu0 %vm36_vm0, %v13_v15  ;;  %639 = vmatmul.mubr.msk.f32.gmra.mrb[2].mxu1 %vm36_vm0, %v21_v16  ;;  %s619_s28 = sshll.u32 %s831_s0, 4  ;;  %s620_s28 = int_to_ptr.vmem [resolvable:$true] %s619_s28 }
  0x11   :  { %161 = vmatprep.mubr.f32.mxu0 %v830_v7  ;;  %209 = vmatprep.mubr.f32.mxu1 %v830_v7  ;;  %s806_s1 = scalar_lea.vmem %s620_s28, 2048  ;;  %p811_p1 = scmp.lt.s32.totalorder %s620_s28, %s620_s28 }
  0x12   :  { %p807_p0 = scmp.ne.s32.totalorder %s620_s28, %s806_s1  ;;  %p812_p2 = scmp.lt.s32.totalorder %s806_s1, %s806_s1 }
  0x14   :  { %632 = vmatmul.mubr.msk.f32.gmra.mrb[4].mxu0 %vm36_vm0, %v14_v17  ;;  %640 = vmatmul.mubr.msk.f32.gmra.mrb[4].mxu1 %vm36_vm0, %v22_v18  ;;  %p813_p3 = por %p812_p2, %p811_p1 }
  0x15   :  { %167 = vmatprep.mubr.f32.mxu0 %v830_v7  ;;  %215 = vmatprep.mubr.f32.mxu1 %v830_v7 }
  0x16   :  { %p814_p4 = pnand %p813_p3, %p807_p0 }
  0x18   :  { %633 = vmatmul.mubr.msk.f32.gmra.mrb[6].mxu0 %vm36_vm0, %v15_v19  ;;  %641 = vmatmul.mubr.msk.f32.gmra.mrb[6].mxu1 %vm36_vm0, %v23_v20 }
  0x19   :  { %173 = vmatprep.mubr.f32.mxu0 %v830_v7  ;;  %221 = vmatprep.mubr.f32.mxu1 %v830_v7 }
  0x1c   :  { %634 = vmatmul.mubr.msk.f32.gmra.mrb[8].mxu0 %vm36_vm0, %v16_v21  ;;  %642 = vmatmul.mubr.msk.f32.gmra.mrb[8].mxu1 %vm36_vm0, %v24_v22 }
  0x1d   :  { %179 = vmatprep.mubr.f32.mxu0 %v830_v7  ;;  %227 = vmatprep.mubr.f32.mxu1 %v830_v7 }
  0x20   :  { %635 = vmatmul.mubr.msk.f32.gmra.mrb[10].mxu0 %vm36_vm0, %v17_v23  ;;  %643 = vmatmul.mubr.msk.f32.gmra.mrb[10].mxu1 %vm36_vm0, %v25_v24 }
  0x21   :  { %185 = vmatprep.mubr.f32.mxu0 %v830_v7  ;;  %233 = vmatprep.mubr.f32.mxu1 %v830_v7 }
  0x24   :  { %636 = vmatmul.mubr.msk.f32.gmra.mrb[12].mxu0 %vm36_vm0, %v18_v25  ;;  %644 = vmatmul.mubr.msk.f32.gmra.mrb[12].mxu1 %vm36_vm0, %v26_v26 }
  0x25   :  { %191 = vmatprep.mubr.f32.mxu0 %v830_v7  ;;  %239 = vmatprep.mubr.f32.mxu1 %v830_v7 }
  0x28   :  { %637 = vmatmul.mubr.msk.f32.gmra.mrb[14].mxu0 %vm36_vm0, %v19_v27  ;;  %645 = vmatmul.mubr.msk.f32.gmra.mrb[14].mxu1 %vm36_vm0, %v27_v28 }
  0xdf   :  { %v937_v29 = vpop.f32.mrb[0].mxu0  ;;  %v939_v30 = vpop.f32.mrb[0].mxu1 }
  0xe0   :  { %v262_v31 = vmin.f32 %v937_v29, 0.0  ;;  %v270_v32 = vmin.f32 %v939_v30, 0.0  ;;  %v943_v33 = vpop.f32.mrb[1].mxu0  ;;  %v945_v34 = vpop.f32.mrb[1].mxu1  ;;  %vm246_vm1 = vcmp.gt.f32.partialorder %v937_v29, 0.0  ;;  %vm254_vm2 = vcmp.gt.f32.partialorder %v939_v30, 0.0 }
  0xe1   :  { %v342_v35 = vmax.f32 %v943_v33, 0.0  ;;  %v350_v36 = vmax.f32 %v945_v34, 0.0 }
  0xe2   :  { %v278_v37 = vmul.f32 1.442695, %v262_v31  ;;  %v294_v38 = vmul.f32 1.442695, %v270_v32 }
  0xe3   :  { %v358_v39 = vmul.f32 -1.0, %v342_v35  ;;  %v366_v40 = vmul.f32 -1.0, %v350_v36  ;;  %v953_v41 = vpop.f32.mrb[2].mxu0  ;;  %v955_v42 = vpop.f32.mrb[2].mxu1 }
  0xe4   :  { %742 = vpow2.f32 %v278_v37  ;;  %v263_v43 = vmin.f32 %v953_v41, 0.0  ;;  %v958_v44 = vpop.f32.mrb[3].mxu0  ;;  %v960_v45 = vpop.f32.mrb[3].mxu1  ;;  %v271_v48 = vmin.f32 %v955_v42, 0.0  ;;  %vm247_vm3 = vcmp.gt.f32.partialorder %v953_v41, 0.0 }
  0xe5   :  { %744 = vpow2.f32 %v294_v38  ;;  %v374_v46 = vmul.f32 1.442695, %v358_v39  ;;  %v390_v47 = vmul.f32 1.442695, %v366_v40  ;;  %v343_v50 = vmax.f32 %v958_v44, 0.0 }
  0xe6   :  { %v280_v49 = vmul.f32 1.442695, %v263_v43  ;;  %v351_v51 = vmax.f32 %v960_v45, 0.0  ;;  %v296_v52 = vmul.f32 1.442695, %v271_v48  ;;  %vm255_vm4 = vcmp.gt.f32.partialorder %v955_v42, 0.0 }
  0xe7   :  { %746 = vpow2.f32 %v374_v46  ;;  %v965_v53 = vpop.f32.mrb[4].mxu0  ;;  %v967_v54 = vpop.f32.mrb[4].mxu1  ;;  %v359_v55 = vmul.f32 -1.0, %v343_v50 }
  0xe8   :  { %748 = vpow2.f32 %v390_v47  ;;  %v367_v56 = vmul.f32 -1.0, %v351_v51  ;;  %v973_v57 = vpop.f32.mrb[5].mxu0  ;;  %v975_v58 = vpop.f32.mrb[5].mxu1  ;;  %v264_v59 = vmin.f32 %v965_v53, 0.0  ;;  %v272_v60 = vmin.f32 %v967_v54, 0.0 }
  0xe9   :  { %750 = vpow2.f32 %v280_v49  ;;  %v376_v61 = vmul.f32 1.442695, %v359_v55  ;;  %v344_v63 = vmax.f32 %v973_v57, 0.0  ;;  %v352_v2 = vmax.f32 %v975_v58, 0.0 }
  0xea   :  { %752 = vpow2.f32 %v296_v52  ;;  %v392_v62 = vmul.f32 1.442695, %v367_v56  ;;  %v282_v0 = vmul.f32 1.442695, %v264_v59  ;;  %v298_v1 = vmul.f32 1.442695, %v272_v60 }
  0xeb   :  { %v982_v3 = vpop.f32.mrb[6].mxu0  ;;  %754 = vpow2.f32 %v376_v61  ;;  %v360_v4 = vmul.f32 -1.0, %v344_v63  ;;  %v988_v6 = vpop.f32.mrb[6].mxu1  ;;  %v368_v8 = vmul.f32 -1.0, %v352_v2  ;;  %vm248_vm5 = vcmp.gt.f32.partialorder %v965_v53, 0.0 }
  0xec   :  { %v265_v5 = vmin.f32 %v982_v3, 0.0  ;;  %v990_v7 = vpop.f32.mrb[7].mxu0  ;;  %756 = vpow2.f32 %v392_v62  ;;  %v273_v9 = vmin.f32 %v988_v6, 0.0  ;;  %v996_v10 = vpop.f32.mrb[7].mxu1  ;;  %vm256_vm6 = vcmp.gt.f32.partialorder %v967_v54, 0.0 }
  0xed   :  { %758 = vpow2.f32 %v282_v0  ;;  %v378_v12 = vmul.f32 1.442695, %v360_v4  ;;  %v345_v14 = vmax.f32 %v990_v7, 0.0  ;;  %v394_v17 = vmul.f32 1.442695, %v368_v8 }
  0xee   :  { %v743_v11 = vpop.eup %742  ;;  %v284_v13 = vmul.f32 1.442695, %v265_v5  ;;  %760 = vpow2.f32 %v298_v1  ;;  %v300_v18 = vmul.f32 1.442695, %v273_v9  ;;  %v353_v22 = vmax.f32 %v996_v10, 0.0 }
  0xef   :  { %v745_v15 = vpop.eup %744  ;;  %v646_v16 = vadd.f32 -1.0, %v743_v11  ;;  %v999_v19 = vpop.f32.mrb[8].mxu0  ;;  %762 = vpow2.f32 %v378_v12  ;;  %v361_v21 = vmul.f32 -1.0, %v345_v14  ;;  %vm249_vm7 = vcmp.gt.f32.partialorder %v982_v3, 0.0 }
  0xf0   :  { %v654_v20 = vadd.f32 -1.0, %v745_v15  ;;  %v1004_v23 = vpop.f32.mrb[8].mxu1  ;;  %v1006_v24 = vpop.f32.mrb[9].mxu0  ;;  %764 = vpow2.f32 %v394_v17  ;;  %v266_v27 = vmin.f32 %v999_v19, 0.0  ;;  %v369_v49 = vmul.f32 -1.0, %v353_v22 }
  0xf1   :  { %v747_v25 = vpop.eup %746  ;;  %v326_v26 = vsel %vm246_vm1, %v937_v29, %v646_v16  ;;  %v1013_v28 = vpop.f32.mrb[9].mxu1  ;;  %766 = vpow2.f32 %v284_v13  ;;  %v380_v43 = vmul.f32 1.442695, %v361_v21  ;;  %vm257_vm8 = vcmp.gt.f32.partialorder %v988_v6, 0.0 }
  0xf2   :  { %v749_v31 = vpop.eup %748  ;;  %v334_v32 = vsel %vm254_vm2, %v939_v30, %v654_v20  ;;  %v406_v37 = vmul.f32 %v747_v25, %v326_v26  ;;  %v502_v38 = vmul.f32 %v747_v25, %v342_v35  ;;  %768 = vpow2.f32 %v300_v18 }
  0xf3   :  { %v751_v29 = vpop.eup %750  ;;  %v414_v39 = vmul.f32 %v749_v31, %v334_v32  ;;  %v510_v40 = vmul.f32 %v749_v31, %v350_v36  ;;  %v1024_v46 = vpop.f32.mrb[10].mxu0  ;;  %770 = vpow2.f32 %v380_v43  ;;  %v396_v62 = vmul.f32 1.442695, %v369_v49 }
  0xf4   :  { %v1026_v47 = vpop.f32.mrb[10].mxu1  ;;  %v753_v30 = vpop.eup %752  ;;  %v694_v48 = vpack.c.bf16 %v406_v37, %v406_v37  ;;  %v518_v33 = vmul.f32 %v747_v25, %v502_v38  ;;  %v647_v35 = vadd.f32 -1.0, %v751_v29  ;;  %v286_v0 = vmul.f32 1.442695, %v266_v27 }
  0xf5   :  { %v1030_v52 = vpop.f32.mrb[11].mxu0  ;;  %v1032_v55 = vpop.f32.mrb[11].mxu1  ;;  %v702_v34 = vpack.c.bf16 %v414_v39, %v414_v39  ;;  %v526_v36 = vmul.f32 %v749_v31, %v510_v40  ;;  %v655_v56 = vadd.f32 -1.0, %v753_v30  ;;  %772 = vpow2.f32 %v396_v62 }
  0xf6   :  { %v755_v59 = vpop.eup %754  ;;  %486 = vst [vmem:[#allocation2] sm:$0xf] %v694_v48  ;;  %v710_v60 = vpack.c.bf16 %v518_v33, %v518_v33  ;;  %v327_v61 = vsel %vm247_vm3, %v953_v41, %v647_v35  ;;  %774 = vpow2.f32 %v286_v0  ;;  %v274_v45 = vmin.f32 %v1004_v23, 0.0 }
  0xf7   :  { %v757_v1 = vpop.eup %756  ;;  %494 = vst [vmem:[#allocation2 + $0x40] sm:$0xf] %v702_v34  ;;  %v718_v4 = vpack.c.bf16 %v526_v36, %v526_v36  ;;  %v335_v5 = vsel %vm255_vm4, %v955_v42, %v655_v56  ;;  %v407_v8 = vmul.f32 %v755_v59, %v327_v61  ;;  %v503_v9 = vmul.f32 %v755_v59, %v343_v50  ;;  %v1043_v11 = vpop.f32.mrb[12].mxu0 }
  0xf8   :  { %v1045_v12 = vpop.f32.mrb[12].mxu1  ;;  %v759_v41 = vpop.eup %758  ;;  %598 = vst [vmem:[#allocation2 + $0x4] sm:$0xf] %v710_v60  ;;  %v415_v13 = vmul.f32 %v757_v1, %v335_v5  ;;  %v511_v15 = vmul.f32 %v757_v1, %v351_v51  ;;  %v346_v37 = vmax.f32 %v1006_v24, 0.0  ;;  %v302_v34 = vmul.f32 1.442695, %v274_v45 }
  0xf9   :  { %v1050_v16 = vpop.f32.mrb[13].mxu0  ;;  %v1052_v42 = vpop.f32.mrb[13].mxu1  ;;  %606 = vst [vmem:[#allocation2 + $0x44] sm:$0xf] %v718_v4  ;;  %v695_v44 = vpack.c.bf16 %v407_v8, %v407_v8  ;;  %v519_v50 = vmul.f32 %v755_v59, %v503_v9  ;;  %v648_v18 = vadd.f32 -1.0, %v759_v41  ;;  %v354_v8 = vmax.f32 %v1013_v28, 0.0 }
  0xfa   :  { %v761_v17 = vpop.eup %760  ;;  %v703_v21 = vpack.c.bf16 %v415_v13, %v415_v13  ;;  %v527_v25 = vmul.f32 %v757_v1, %v511_v15  ;;  %776 = vpow2.f32 %v302_v34  ;;  %v267_v9 = vmin.f32 %v1024_v46, 0.0 }
  0xfb   :  { %v763_v20 = vpop.eup %762  ;;  %v656_v26 = vadd.f32 -1.0, %v761_v17  ;;  %487 = vst [vmem:[#allocation2 + $0x8] sm:$0xf] %v695_v44  ;;  %v711_v27 = vpack.c.bf16 %v519_v50, %v519_v50  ;;  %v328_v31 = vsel %vm248_vm5, %v965_v53, %v648_v18  ;;  %v1061_v38 = vpop.f32.mrb[14].mxu0  ;;  %v275_v15 = vmin.f32 %v1026_v47, 0.0 }
  0xfc   :  { %v765_v51 = vpop.eup %764  ;;  %v504_v32 = vmul.f32 %v763_v20, %v344_v63  ;;  %v1063_v29 = vpop.f32.mrb[14].mxu1  ;;  %495 = vst [vmem:[#allocation2 + $0x48] sm:$0xf] %v703_v21  ;;  %v719_v40 = vpack.c.bf16 %v527_v25, %v527_v25  ;;  %v408_v30 = vmul.f32 %v763_v20, %v328_v31  ;;  %v370_v7 = vmul.f32 -1.0, %v354_v8 }
  0xfd   :  { %v767_v39 = vpop.eup %766  ;;  %v336_v43 = vsel %vm256_vm6, %v967_v54, %v656_v26  ;;  %v512_v53 = vmul.f32 %v765_v51, %v352_v2  ;;  %v1070_v48 = vpop.f32.mrb[15].mxu0  ;;  %599 = vst [vmem:[#allocation2 + $0xc] sm:$0xf] %v711_v27  ;;  %v362_v54 = vmul.f32 -1.0, %v346_v37  ;;  %v288_v50 = vmul.f32 1.442695, %v267_v9 }
  0xfe   :  { %v1072_v57 = vpop.f32.mrb[15].mxu1  ;;  %v769_v63 = vpop.eup %768  ;;  %v520_v33 = vmul.f32 %v763_v20, %v504_v32  ;;  %v416_v35 = vmul.f32 %v765_v51, %v336_v43  ;;  %v649_v49 = vadd.f32 -1.0, %v767_v39  ;;  %607 = vst [vmem:[#allocation2 + $0x4c] sm:$0xf] %v719_v40  ;;  %v696_v36 = vpack.c.bf16 %v408_v30, %v408_v30 }
  0xff   :  { %v528_v56 = vmul.f32 %v765_v51, %v512_v53  ;;  %v657_v59 = vadd.f32 -1.0, %v769_v63  ;;  %v771_v60 = vpop.eup %770  ;;  %v382_v5 = vmul.f32 1.442695, %v362_v54  ;;  %v304_v18 = vmul.f32 1.442695, %v275_v15 }
 0x100   :  { %v712_v58 = vpack.c.bf16 %v520_v33, %v520_v33  ;;  %v704_v2 = vpack.c.bf16 %v416_v35, %v416_v35  ;;  %v329_v61 = vsel %vm249_vm7, %v982_v3, %v649_v49  ;;  %488 = vst [vmem:[#allocation2 + $0x10] sm:$0xf] %v696_v36  ;;  %v505_v4 = vmul.f32 %v771_v60, %v345_v14  ;;  %v773_v41 = vpop.eup %772 }
 0x101   :  { %v720_v62 = vpack.c.bf16 %v528_v56, %v528_v56  ;;  %v337_v0 = vsel %vm257_vm8, %v988_v6, %v657_v59  ;;  %v409_v1 = vmul.f32 %v771_v60, %v329_v61  ;;  %v775_v17 = vpop.eup %774  ;;  %v513_v6 = vmul.f32 %v773_v41, %v353_v22 }
 0x102   :  { %600 = vst [vmem:[#allocation2 + $0x14] sm:$0xf] %v712_v58  ;;  %496 = vst [vmem:[#allocation2 + $0x50] sm:$0xf] %v704_v2  ;;  %v521_v13 = vmul.f32 %v771_v60, %v505_v4  ;;  %v417_v44 = vmul.f32 %v773_v41, %v337_v0  ;;  %778 = vpow2.f32 %v382_v5  ;;  %v398_v25 = vmul.f32 1.442695, %v370_v7 }
 0x103   :  { %608 = vst [vmem:[#allocation2 + $0x54] sm:$0xf] %v720_v62  ;;  %v697_v3 = vpack.c.bf16 %v409_v1, %v409_v1  ;;  %v529_v21 = vmul.f32 %v773_v41, %v513_v6  ;;  %v347_v26 = vmax.f32 %v1030_v52, 0.0  ;;  %v650_v45 = vadd.f32 -1.0, %v775_v17 }
 0x104   :  { %v713_v14 = vpack.c.bf16 %v521_v13, %v521_v13  ;;  %v705_v20 = vpack.c.bf16 %v417_v44, %v417_v44  ;;  %780 = vpow2.f32 %v288_v50  ;;  %v355_v51 = vmax.f32 %v1032_v55, 0.0  ;;  %v777_v39 = vpop.eup %776 }
 0x105   :  { %489 = vst [vmem:[#allocation2 + $0x18] sm:$0xf] %v697_v3  ;;  %v721_v10 = vpack.c.bf16 %v529_v21, %v529_v21  ;;  %782 = vpow2.f32 %v398_v25  ;;  %v363_v22 = vmul.f32 -1.0, %v347_v26  ;;  %v268_v27 = vmin.f32 %v1043_v11, 0.0 }
 0x106   :  { %601 = vst [vmem:[#allocation2 + $0x1c] sm:$0xf] %v713_v14  ;;  %497 = vst [vmem:[#allocation2 + $0x58] sm:$0xf] %v705_v20  ;;  %vm250_vm9 = vcmp.gt.f32.partialorder %v999_v19, 0.0  ;;  %784 = vpow2.f32 %v304_v18  ;;  %v371_v31 = vmul.f32 -1.0, %v355_v51 }
 0x107   :  { %v276_v32 = vmin.f32 %v1045_v12, 0.0  ;;  %609 = vst [vmem:[#allocation2 + $0x5c] sm:$0xf] %v721_v10  ;;  %v384_v40 = vmul.f32 1.442695, %v363_v22  ;;  %v348_v30 = vmax.f32 %v1050_v16, 0.0  ;;  %v330_v63 = vsel %vm250_vm9, %v999_v19, %v650_v45 }
 0x108   :  { %v290_v43 = vmul.f32 1.442695, %v268_v27  ;;  %v356_v53 = vmax.f32 %v1052_v42, 0.0  ;;  %v658_v33 = vadd.f32 -1.0, %v777_v39  ;;  %v400_v35 = vmul.f32 1.442695, %v371_v31 }
 0x109   :  { %v306_v49 = vmul.f32 1.442695, %v276_v32  ;;  %786 = vpow2.f32 %v384_v40  ;;  %v364_v34 = vmul.f32 -1.0, %v348_v30  ;;  %v269_v56 = vmin.f32 %v1061_v38, 0.0 }
 0x10a   :  { %v372_v36 = vmul.f32 -1.0, %v356_v53  ;;  %vm258_vm10 = vcmp.gt.f32.partialorder %v1004_v23, 0.0  ;;  %788 = vpow2.f32 %v400_v35  ;;  %v277_v59 = vmin.f32 %v1063_v29, 0.0 }
 0x10b   :  { %790 = vpow2.f32 %v290_v43  ;;  %v386_v19 = vmul.f32 1.442695, %v364_v34  ;;  %v292_v58 = vmul.f32 1.442695, %v269_v56  ;;  %v338_v0 = vsel %vm258_vm10, %v1004_v23, %v658_v33 }
 0x10c   :  { %v779_v54 = vpop.eup %778  ;;  %v402_v60 = vmul.f32 1.442695, %v372_v36  ;;  %792 = vpow2.f32 %v306_v49  ;;  %v308_v62 = vmul.f32 1.442695, %v277_v59  ;;  %v349_v1 = vmax.f32 %v1070_v48, 0.0 }
 0x10d   :  { %v410_v2 = vmul.f32 %v779_v54, %v330_v63  ;;  %v506_v61 = vmul.f32 %v779_v54, %v346_v37  ;;  %794 = vpow2.f32 %v386_v19  ;;  %v357_v4 = vmax.f32 %v1072_v57, 0.0 }
 0x10e   :  { %v781_v5 = vpop.eup %780  ;;  %vm251_vm11 = vcmp.gt.f32.partialorder %v1024_v46, 0.0  ;;  %796 = vpow2.f32 %v402_v60  ;;  %v365_v24 = vmul.f32 -1.0, %v349_v1  ;;  %vm259_vm12 = vcmp.gt.f32.partialorder %v1026_v47, 0.0 }
 0x10f   :  { %v698_v9 = vpack.c.bf16 %v410_v2, %v410_v2  ;;  %v522_v41 = vmul.f32 %v779_v54, %v506_v61  ;;  %v783_v3 = vpop.eup %782  ;;  %v651_v13 = vadd.f32 -1.0, %v781_v5  ;;  %798 = vpow2.f32 %v292_v58 }
 0x110   :  { %v373_v23 = vmul.f32 -1.0, %v357_v4  ;;  %v785_v37 = vpop.eup %784  ;;  %v418_v17 = vmul.f32 %v783_v3, %v338_v0  ;;  %v514_v44 = vmul.f32 %v783_v3, %v354_v8  ;;  %800 = vpow2.f32 %v308_v62 }
 0x111   :  { %490 = vst [vmem:[#allocation2 + $0x20] sm:$0xf] %v698_v9  ;;  %v714_v15 = vpack.c.bf16 %v522_v41, %v522_v41  ;;  %v331_v6 = vsel %vm251_vm11, %v1024_v46, %v651_v13  ;;  %v659_v7 = vadd.f32 -1.0, %v785_v37  ;;  %v388_v14 = vmul.f32 1.442695, %v365_v24 }
 0x112   :  { %v404_v50 = vmul.f32 1.442695, %v373_v23  ;;  %v706_v18 = vpack.c.bf16 %v418_v17, %v418_v17  ;;  %v530_v20 = vmul.f32 %v783_v3, %v514_v44  ;;  %vm252_vm13 = vcmp.gt.f32.partialorder %v1043_v11, 0.0 }
 0x113   :  { %602 = vst [vmem:[#allocation2 + $0x24] sm:$0xf] %v714_v15  ;;  %v787_v21 = vpop.eup %786  ;;  %v339_v25 = vsel %vm259_vm12, %v1026_v47, %v659_v7  ;;  %802 = vpow2.f32 %v388_v14  ;;  %vm260_vm14 = vcmp.gt.f32.partialorder %v1045_v12, 0.0  ;;  %vm253_vm15 = vcmp.gt.f32.partialorder %v1061_v38, 0.0 }
 0x114   :  { %v789_v45 = vpop.eup %788  ;;  %498 = vst [vmem:[#allocation2 + $0x60] sm:$0xf] %v706_v18  ;;  %v722_v10 = vpack.c.bf16 %v530_v20, %v530_v20  ;;  %v411_v28 = vmul.f32 %v787_v21, %v331_v6  ;;  %v507_v8 = vmul.f32 %v787_v21, %v347_v26  ;;  %804 = vpow2.f32 %v404_v50 }
 0x115   :  { %v791_v46 = vpop.eup %790  ;;  %v419_v22 = vmul.f32 %v789_v45, %v339_v25  ;;  %v515_v27 = vmul.f32 %v789_v45, %v355_v51  ;;  %vm261_vm0 = vcmp.gt.f32.partialorder %v1063_v29, 0.0 }
 0x116   :  { %v793_v31 = vpop.eup %792  ;;  %610 = vst [vmem:[#allocation2 + $0x64] sm:$0xf] %v722_v10  ;;  %v699_v32 = vpack.c.bf16 %v411_v28, %v411_v28  ;;  %v523_v39 = vmul.f32 %v787_v21, %v507_v8  ;;  %v652_v40 = vadd.f32 -1.0, %v791_v46 }
 0x117   :  { %v795_v47 = vpop.eup %794  ;;  %v707_v43 = vpack.c.bf16 %v419_v22, %v419_v22  ;;  %v531_v63 = vmul.f32 %v789_v45, %v515_v27  ;;  %v660_v33 = vadd.f32 -1.0, %v793_v31 }
 0x118   :  { %v797_v35 = vpop.eup %796  ;;  %491 = vst [vmem:[#allocation2 + $0x28] sm:$0xf] %v699_v32  ;;  %v715_v52 = vpack.c.bf16 %v523_v39, %v523_v39  ;;  %v332_v26 = vsel %vm252_vm13, %v1043_v11, %v652_v40  ;;  %v508_v55 = vmul.f32 %v795_v47, %v348_v30 }
 0x119   :  { %v799_v51 = vpop.eup %798  ;;  %499 = vst [vmem:[#allocation2 + $0x68] sm:$0xf] %v707_v43  ;;  %v723_v49 = vpack.c.bf16 %v531_v63, %v531_v63  ;;  %v340_v34 = vsel %vm260_vm14, %v1045_v12, %v660_v33  ;;  %v412_v36 = vmul.f32 %v795_v47, %v332_v26  ;;  %v516_v56 = vmul.f32 %v797_v35, %v356_v53 }
 0x11a   :  { %v801_v59 = vpop.eup %800  ;;  %603 = vst [vmem:[#allocation2 + $0x2c] sm:$0xf] %v715_v52  ;;  %v524_v54 = vmul.f32 %v795_v47, %v508_v55  ;;  %v420_v19 = vmul.f32 %v797_v35, %v340_v34  ;;  %v653_v60 = vadd.f32 -1.0, %v799_v51 }
 0x11b   :  { %611 = vst [vmem:[#allocation2 + $0x6c] sm:$0xf] %v723_v49  ;;  %v700_v11 = vpack.c.bf16 %v412_v36, %v412_v36  ;;  %v532_v58 = vmul.f32 %v797_v35, %v516_v56  ;;  %v661_v16 = vadd.f32 -1.0, %v801_v59 }
 0x11c   :  { %v716_v30 = vpack.c.bf16 %v524_v54, %v524_v54  ;;  %v708_v2 = vpack.c.bf16 %v420_v19, %v420_v19  ;;  %v333_v61 = vsel %vm253_vm15, %v1061_v38, %v653_v60 }
 0x11d   :  { %v803_v12 = vpop.eup %802  ;;  %492 = vst [vmem:[#allocation2 + $0x30] sm:$0xf] %v700_v11  ;;  %v724_v42 = vpack.c.bf16 %v532_v58, %v532_v58  ;;  %v341_v53 = vsel %vm261_vm0, %v1063_v29, %v661_v16 }
 0x11e   :  { %v805_v62 = vpop.eup %804  ;;  %604 = vst [vmem:[#allocation2 + $0x34] sm:$0xf] %v716_v30  ;;  %500 = vst [vmem:[#allocation2 + $0x70] sm:$0xf] %v708_v2  ;;  %v413_v0 = vmul.f32 %v803_v12, %v333_v61  ;;  %v509_v5 = vmul.f32 %v803_v12, %v349_v1 }
 0x11f   :  { %612 = vst [vmem:[#allocation2 + $0x74] sm:$0xf] %v724_v42  ;;  %v421_v9 = vmul.f32 %v805_v62, %v341_v53  ;;  %v517_v41 = vmul.f32 %v805_v62, %v357_v4 }
 0x120   :  { %v701_v38 = vpack.c.bf16 %v413_v0, %v413_v0  ;;  %v525_v3 = vmul.f32 %v803_v12, %v509_v5 }
 0x121   :  { %v709_v13 = vpack.c.bf16 %v421_v9, %v421_v9  ;;  %v533_v24 = vmul.f32 %v805_v62, %v517_v41 }
 0x122   :  { %493 = vst [vmem:[#allocation2 + $0x38] sm:$0xf] %v701_v38  ;;  %v717_v29 = vpack.c.bf16 %v525_v3, %v525_v3 }
 0x123   :  { %501 = vst [vmem:[#allocation2 + $0x78] sm:$0xf] %v709_v13  ;;  %v725_v23 = vpack.c.bf16 %v533_v24, %v533_v24 }
 0x124   :  { %605 = vst [vmem:[#allocation2 + $0x3c] sm:$0xf] %v717_v29 }
 0x125   :  { %613 = vst [vmem:[#allocation2 + $0x7c] sm:$0xf] %v725_v23 }
 0x126   :  { %817 = shalt.err (!%p814_p4)
}
 0x127   :  { %s818_s3 = scalar_lea.hbm %s1159_s2, 2048 }
 0x128   :  { %p819_p5 = scmp.ne.s32.totalorder %s1159_s2, %s818_s3  ;;  %p822_p6 = scmp.lt.u32.totalorder %s818_s3, %s1159_s2 }
 0x12a   :  { %p824_p7 = pnand %p822_p6, %p819_p5 }
 0x12c   :  { %827 = shalt.err (!%p824_p7)
}
 0x12d   :  { %s832_s8 = smov 128   ;;  %s833_s9 = smov 8  }
 0x12e   :  { %625 = dma.vmem_to_hbm [thread:$0]  %s620_s28, 2048, %s1159_s2, [#allocation3], %s832_s8, %s832_s8, %s833_s9  }
 0x12f   :  { %828 = dma.done.wait [#allocation3], 2048  }
 0x130   :  { %829 = vsyncadd [#allocation3], 4294965248 }
 0x131   :  { %629 = vsyncpa [#allocation3], 1 }

</bundles_post_ra>
